<compile_context>
chip_gen: v6e
topology: v6e:2x2x1
jax: 0.10.0
libtpu: 0.0.40
codegen_flags: <defaults>
</compile_context>

<pallas_src>
import jax
import jax.numpy as jnp
import numpy as np
from jax.experimental import pallas as pl
from jax.experimental.pallas import tpu as pltpu


# ---------------------------------------------------------------------------
# Hot kernel: per-tile LayerNorm + modulate + output projection
#   x_ref      : (1, TS, D)   activation tile
#   shift_ref  : (1, 1, D)    per-batch shift (f32)
#   scale1_ref : (1, 1, D)    per-batch (1 + scale) (f32)
#   w_ref      : (D, P_pad)   output projection weight (lane-dense, resident)
#   o_ref      : (1, TS, P_pad)
# ---------------------------------------------------------------------------
def final_layer_kernel(x_ref, shift_ref, scale1_ref, w_ref, o_ref):
    x = x_ref[0].astype(jnp.float32)                 # (TS, D) -- LN stats in f32
    mean = jnp.mean(x, axis=-1, keepdims=True)
    xc = x - mean
    var = jnp.mean(xc * xc, axis=-1, keepdims=True)
    xn = xc * jax.lax.rsqrt(var + 1e-6)

    shift = shift_ref[0]                             # (1, D) f32
    scale1 = scale1_ref[0]                           # (1, D) f32, already 1 + scale
    mod = xn * scale1 + shift                        # (TS, D)

    o_ref[0] = jnp.dot(mod.astype(w_ref.dtype), w_ref[...],
                       preferred_element_type=jnp.float32).astype(o_ref.dtype)


def _pick_tile_rows(rows, d, p_pad, x_itemsize, out_itemsize,
                    budget_bytes=24 * 1024 * 1024, max_tile=4096):
    """Largest multiple-of-8 divisor of `rows` (capped at `max_tile`) whose
    double-buffered x/out tiles plus a (conservatively double-buffered) weight
    fit the VMEM budget. Falls back to a full-extent slab for tiny inputs."""
    def fits(ts):
        need = (2 * ts * d * x_itemsize          # x double-buffered
                + 2 * ts * p_pad * out_itemsize  # out double-buffered
                + 2 * d * p_pad * 4)             # resident weight (worst case 2x)
        return need <= budget_bytes

    best = None
    ts = 8
    while ts <= min(rows, max_tile):
        if rows % ts == 0 and fits(ts):
            best = ts
        ts += 8
    if best is not None:
        return best
    # No multiple-of-8 divisor fits the budget; smallest multiple-of-8 divisor,
    # else the full slab (full-extent block dims are always legal).
    for ts in range(8, rows + 1, 8):
        if rows % ts == 0:
            return ts
    return rows


def final_layer_forward(x_bt_hw_d, emb_b_d, w_mod_t, w_lin_t,
                        adaln_lora_b_3d=None):
    """FinalLayer forward. Weights stored transposed (in, out).

    w_mod_t: either a (D, 2D) array (use_adaln_lora=False) or a tuple/list of
             [(D, R), (R, 2D)] arrays (use_adaln_lora=True); in the latter case
             adaln_lora_b_3d (B, >=2D) is added to the modulation.
    """
    BT, HW, D = x_bt_hw_d.shape
    B = emb_b_d.shape[0]
    assert BT % B == 0, "x_BT_HW_D leading dim must be divisible by batch"
    T = BT // B
    P = w_lin_t.shape[1]
    assert w_lin_t.shape[0] == D

    # --- adaLN modulation: tiny matmul(s), plain XLA (no dedicated kernel) --
    h = jax.nn.silu(emb_b_d.astype(jnp.float32))
    if isinstance(w_mod_t, (tuple, list)):           # use_adaln_lora=True
        for w in w_mod_t:
            h = h @ w.astype(jnp.float32)
        mod = h
        if adaln_lora_b_3d is not None:
            mod = mod + adaln_lora_b_3d[:, :2 * D].astype(jnp.float32)
    else:
        assert w_mod_t.shape == (D, 2 * D)
        mod = h @ w_mod_t.astype(jnp.float32)
    shift_b = mod[:, :D].reshape(B, 1, D)             # (B, 1, D) f32
    scale1_b = (1.0 + mod[:, D:]).reshape(B, 1, D)    # (B, 1, D) f32, 1 + scale

    # --- lane-dense output: pad projection to a multiple of 128 lanes -------
    P_pad = max(128, ((P + 127) // 128) * 128)
    w_lin_pad = (jnp.pad(w_lin_t, ((0, 0), (0, P_pad - P)))
                 if P_pad != P else w_lin_t)

    # --- fold T into the spatial axis so shift/scale index per batch --------
    rows = T * HW
    x_b_rows_d = x_bt_hw_d.reshape(B, rows, D)

    out_dtype = x_bt_hw_d.dtype
    TS = _pick_tile_rows(rows, D, P_pad,
                         x_bt_hw_d.dtype.itemsize,
                         jnp.dtype(out_dtype).itemsize)
    grid = (B, rows // TS)

    out = pl.pallas_call(
        final_layer_kernel,
        out_shape=jax.ShapeDtypeStruct((B, rows, P_pad), out_dtype),
        grid=grid,
        in_specs=[
            pl.BlockSpec((1, TS, D), lambda b, s: (b, s, 0)),   # x tile
            pl.BlockSpec((1, 1, D), lambda b, s: (b, 0, 0)),    # shift (per batch)
            pl.BlockSpec((1, 1, D), lambda b, s: (b, 0, 0)),    # 1+scale (per batch)
            pl.BlockSpec((D, P_pad), lambda b, s: (0, 0)),      # resident weight
        ],
        out_specs=pl.BlockSpec((1, TS, P_pad), lambda b, s: (b, s, 0)),
        compiler_params=pltpu.CompilerParams(
            dimension_semantics=("parallel", "parallel"),
            vmem_limit_bytes=32 * 1024 * 1024),
    )(x_b_rows_d, shift_b, scale1_b, w_lin_pad)

    out = out.reshape(BT, HW, P_pad)
    return out[..., :P] if P_pad != P else out


# ---------------------------------------------------------------------------
# Pure-JAX reference for a correctness check
# ---------------------------------------------------------------------------
def reference_forward(x, emb, w_mod_t, w_lin_t):
    BT, HW, D = x.shape
    B = emb.shape[0]
    T = BT // B
    mod = jax.nn.silu(emb) @ w_mod_t
    shift, scale = mod[:, :D], mod[:, D:]
    shift = jnp.repeat(shift, T, axis=0)
    scale = jnp.repeat(scale, T, axis=0)
    mean = jnp.mean(x, axis=-1, keepdims=True)
    var = jnp.mean((x - mean) ** 2, axis=-1, keepdims=True)
    xn = (x - mean) / jnp.sqrt(var + 1e-6)
    xm = xn * (1.0 + scale[:, None, :]) + shift[:, None, :]
    return jnp.einsum("bsd,dp->bsp", xm, w_lin_t)


if __name__ == "__main__":
    # Module config (small, consistent with FinalLayer.__init__)
    hidden_size = 32                       # D
    spatial_patch_size = 2
    temporal_patch_size = 1
    out_channels = 4
    P = spatial_patch_size * spatial_patch_size * temporal_patch_size * out_channels  # 16

    B, T, HW = 2, 4, 64
    BT = B * T
    D = hidden_size

    key = jax.random.PRNGKey(0)
    kx, ke, kwm, kwl = jax.random.split(key, 4)

    x = jax.random.normal(kx, (BT, HW, D), dtype=jnp.float32)
    emb = jax.random.normal(ke, (B, D), dtype=jnp.float32)

    # Deterministic synthetic parameters, stored transposed: (in, out)
    w_mod_t = jax.random.normal(kwm, (D, 2 * D), dtype=jnp.float32) * 0.02
    w_lin_t = jax.random.normal(kwl, (D, P), dtype=jnp.float32) * 0.02

    fwd = jax.jit(final_layer_forward)
    out = jax.block_until_ready(fwd(x, emb, w_mod_t, w_lin_t))

    ref = reference_forward(x, emb, w_mod_t, w_lin_t)
    np.testing.assert_allclose(np.asarray(out), np.asarray(ref),
                               rtol=1e-3, atol=1e-3)

    print("KERNEL_OK")
</pallas_src>

<mosaic_0001>
module attributes {stable_mosaic.version = 11 : i64} {
  func.func @final_layer_kernel(%arg0: i32, %arg1: i32, %arg2: memref<1x256x32xf32, #tpu.memory_space<vmem>>, %arg3: memref<1x1x32xf32, #tpu.memory_space<vmem>>, %arg4: memref<1x1x32xf32, #tpu.memory_space<vmem>>, %arg5: memref<32x128xf32, #tpu.memory_space<vmem>>, %arg6: memref<1x256x128xf32, #tpu.memory_space<vmem>>) attributes {dimension_semantics = [#tpu.dimension_semantics<parallel>, #tpu.dimension_semantics<parallel>], iteration_bounds = array<i64: 2, 1>, scalar_prefetch = 0 : i64, scratch_operands = 0 : i64, tpu.core_type = #tpu.core_type<tc>, window_params = [{transform_indices = @transform_0, window_bounds = array<i64: 1, 256, 32>}, {transform_indices = @transform_1, window_bounds = array<i64: 1, 1, 32>}, {transform_indices = @transform_2, window_bounds = array<i64: 1, 1, 32>}, {pipeline_mode = #tpu.pipeline_mode<synchronous>, transform_indices = @transform_3, window_bounds = array<i64: 32, 128>}, {transform_indices = @transform_4, window_bounds = array<i64: 1, 256, 128>}]} {
    %c0 = arith.constant 0 : index
    %c0_0 = arith.constant 0 : index
    %c0_1 = arith.constant 0 : index
    %0 = vector.load %arg2[%c0, %c0_0, %c0_1] : memref<1x256x32xf32, #tpu.memory_space<vmem>>, vector<1x256x32xf32>
    %1 = vector.shape_cast %0 : vector<1x256x32xf32> to vector<256x32xf32>
    %cst = arith.constant dense<0.000000e+00> : vector<256xf32>
    %2 = vector.multi_reduction <add>, %1, %cst [1] : vector<256x32xf32> to vector<256xf32>
    %3 = vector.shape_cast %2 : vector<256xf32> to vector<256x1xf32>
    %cst_2 = arith.constant 3.200000e+01 : f32
    %4 = vector.broadcast %cst_2 : f32 to vector<256x1xf32>
    %5 = arith.divf %3, %4 : vector<256x1xf32>
    %6 = vector.broadcast %5 : vector<256x1xf32> to vector<256x32xf32>
    %7 = arith.subf %1, %6 : vector<256x32xf32>
    %8 = arith.mulf %7, %7 : vector<256x32xf32>
    %cst_3 = arith.constant dense<0.000000e+00> : vector<256xf32>
    %9 = vector.multi_reduction <add>, %8, %cst_3 [1] : vector<256x32xf32> to vector<256xf32>
    %10 = vector.shape_cast %9 : vector<256xf32> to vector<256x1xf32>
    %cst_4 = arith.constant 3.200000e+01 : f32
    %11 = vector.broadcast %cst_4 : f32 to vector<256x1xf32>
    %12 = arith.divf %10, %11 : vector<256x1xf32>
    %cst_5 = arith.constant 9.99999997E-7 : f32
    %13 = vector.broadcast %cst_5 : f32 to vector<256x1xf32>
    %14 = arith.addf %12, %13 : vector<256x1xf32>
    %15 = math.rsqrt %14 : vector<256x1xf32>
    %16 = vector.broadcast %15 : vector<256x1xf32> to vector<256x32xf32>
    %17 = arith.mulf %7, %16 : vector<256x32xf32>
    %c0_6 = arith.constant 0 : index
    %c0_7 = arith.constant 0 : index
    %c0_8 = arith.constant 0 : index
    %18 = vector.load %arg3[%c0_6, %c0_7, %c0_8] : memref<1x1x32xf32, #tpu.memory_space<vmem>>, vector<1x1x32xf32>
    %19 = vector.shape_cast %18 : vector<1x1x32xf32> to vector<1x32xf32>
    %c0_9 = arith.constant 0 : index
    %c0_10 = arith.constant 0 : index
    %c0_11 = arith.constant 0 : index
    %20 = vector.load %arg4[%c0_9, %c0_10, %c0_11] : memref<1x1x32xf32, #tpu.memory_space<vmem>>, vector<1x1x32xf32>
    %21 = vector.shape_cast %20 : vector<1x1x32xf32> to vector<1x32xf32>
    %22 = vector.broadcast %21 : vector<1x32xf32> to vector<256x32xf32>
    %23 = arith.mulf %17, %22 : vector<256x32xf32>
    %24 = vector.broadcast %19 : vector<1x32xf32> to vector<256x32xf32>
    %25 = arith.addf %23, %24 : vector<256x32xf32>
    %c0_12 = arith.constant 0 : index
    %c0_13 = arith.constant 0 : index
    %26 = vector.load %arg5[%c0_12, %c0_13] : memref<32x128xf32, #tpu.memory_space<vmem>>, vector<32x128xf32>
    %cst_14 = arith.constant dense<0.000000e+00> : vector<256x128xf32>
    %27 = tpu.matmul %25, %26, %cst_14 {dimension_numbers = #tpu.dot_dimension_numbers<[1], [0], [0], [1], [0, 0, 1, 1], [], []>} : vector<256x32xf32>, vector<32x128xf32>, vector<256x128xf32> -> vector<256x128xf32>
    %c0_15 = arith.constant 0 : index
    %c0_16 = arith.constant 0 : index
    %c0_17 = arith.constant 0 : index
    %28 = vector.load %arg6[%c0_15, %c0_16, %c0_17] : memref<1x256x128xf32, #tpu.memory_space<vmem>>, vector<1x256x128xf32>
    %29 = vector.shape_cast %28 : vector<1x256x128xf32> to vector<256x128xf32>
    %30 = vector.shape_cast %27 : vector<256x128xf32> to vector<1x256x128xf32>
    tpu.vector_store %arg6[%c0_15, %c0_16, %c0_17], %30 {strides = array<i32>} : memref<1x256x128xf32, #tpu.memory_space<vmem>>, vector<1x256x128xf32>,
    return
  }
  func.func @transform_0(%arg0: i32, %arg1: i32) -> (i32, i32, i32) {
    %c0_i32 = arith.constant 0 : i32
    %c0_i32_0 = arith.constant 0 : i32
    return %arg0, %arg1, %c0_i32 : i32, i32, i32
  }
  func.func @transform_1(%arg0: i32, %arg1: i32) -> (i32, i32, i32) {
    %c0_i32 = arith.constant 0 : i32
    %c0_i32_0 = arith.constant 0 : i32
    %c0_i32_1 = arith.constant 0 : i32
    return %arg0, %c0_i32, %c0_i32_0 : i32, i32, i32
  }
  func.func @transform_2(%arg0: i32, %arg1: i32) -> (i32, i32, i32) {
    %c0_i32 = arith.constant 0 : i32
    %c0_i32_0 = arith.constant 0 : i32
    %c0_i32_1 = arith.constant 0 : i32
    return %arg0, %c0_i32, %c0_i32_0 : i32, i32, i32
  }
  func.func @transform_3(%arg0: i32, %arg1: i32) -> (i32, i32) {
    %c0_i32 = arith.constant 0 : i32
    %c0_i32_0 = arith.constant 0 : i32
    %c0_i32_1 = arith.constant 0 : i32
    return %c0_i32, %c0_i32_0 : i32, i32
  }
  func.func @transform_4(%arg0: i32, %arg1: i32) -> (i32, i32, i32) {
    %c0_i32 = arith.constant 0 : i32
    %c0_i32_0 = arith.constant 0 : i32
    return %arg0, %arg1, %c0_i32 : i32, i32, i32
  }
}

</mosaic_0001>

<bundles_post_ra>
// kernel: final_layer_forward.1
= control target key start
LH: loop header
LB: loop body
LE: loop exit
PB: predicated region body
PF: predicated region fallthrough
CT: control target
= control target key end

     0   :  { %s1539_s15 = smov 0   ;;  %s1541_s16 = smov 0   ;;  %s2119_s0 = inlined_call_operand.vmem [shape: f32[2,256,32], index: 0, kind: input, shape index: {}]   ;;  %s2120_s1 = inlined_call_operand.vmem [shape: f32[2,1,32], index: 1, kind: input, shape index: {}]   ;;  %s2121_s2 = inlined_call_operand.vmem [shape: f32[2,1,32], index: 2, kind: input, shape index: {}]   ;;  %s2122_s3 = inlined_call_operand.vmem [shape: f32[32,128], index: 3, kind: input, shape index: {}]   ;;  %s2123_s4 = inlined_call_operand.vmem [shape: f32[2,256,128], index: 4, kind: output, shape index: {}]  }
   0x1   :  { %s1543_s17 = smov 0  }
   0x2 LB: > { %s26_s18 = sadd.s32 1, %s1508_s16  ;;  %p1259_p0 = scmp.ge.s32.totalorder %s1512_s17, 1  ;;  %s1512_s17 = sphi %s1543_s17, %s14_s17   ;;  %s1508_s16 = sphi %s1541_s16, %s2125_s16   ;;  %s1504_s15 = sphi %s1539_s15, %s2124_s15  }
   0x3   : > { %p28_p1 = scmp.ge.s32.totalorder %s26_s18, 2  ;;  %p199_p2 = scmp.lt.s32.totalorder %s1512_s17, 3 }
   0x5   : > { %s2127_s18 = smov (%p28_p1, %s26_s18), 0  ;;  %p200_p3 = pnand %p1259_p0, %p199_p2 }
   0x6   : > { %p240_p4 = scmp.lt.s32.totalorder (!%p200_p3), %s1504_s15, 1 }
   0x7   : > { %203 = sbr.rel (%p200_p3) target bundleno = 584 (0x248), region = 36 }
   0xc   : > { %s2129_s15 = smov (!%p240_p4, %s1504_s15), 1  ;;  %vm297_vm0 = vcmask 261120  }
   0xd   : > { %s1300_s19 = sshll.u32 %s2129_s15, 8  ;;  %s254_s7 = scalar_lea.vmem %s2121_s2, %s2129_s15 }
   0xe   : > { %s1565_s22 = scalar_lea.vmem %s2119_s0, %s1300_s19  ;;  %s251_s10 = scalar_lea.vmem %s2120_s1, %s2129_s15 }
   0xf   : > { %v1568_v0 = vld [vmem:[%s1565_s22] sm:$0xff]  ;;  %v1571_v1 = vld [vmem:[%s1565_s22 + $0x8] sm:$0xff]  ;;  %v1588_v8 = vld [vmem:[%s1565_s22 + $0x10] sm:$0xff]  ;;  %s2076_s13 = scalar_lea.vmem %s2123_s4, %s1300_s19 }
  0x10   : > { %v1574_v2 = vld [vmem:[%s1565_s22 + $0x80] sm:$0xff]  ;;  %v298_v3 = vsel %vm297_vm0, %v1568_v0, 0.0  ;;  %v301_v4 = vsel %vm297_vm0, %v1571_v1, 0.0  ;;  %v1581_v5 = vld [vmem:[%s1565_s22 + $0x88] sm:$0xff]  ;;  %v1591_v9 = vld [vmem:[%s1565_s22 + $0x90] sm:$0xff]  ;;  %v304_v10 = vsel %vm297_vm0, %v1588_v8, 0.0 }
  0x11   : > { %299 = vadd.xlane.f32.xlu0 %v298_v3  ;;  %302 = vadd.xlane.f32.xlu1 %v301_v4  ;;  %v346_v6 = vsel %vm297_vm0, %v1574_v2, 0.0  ;;  %v349_v7 = vsel %vm297_vm0, %v1581_v5, 0.0  ;;  %v352_v11 = vsel %vm297_vm0, %v1591_v9, 0.0  ;;  %v1598_v12 = vld [vmem:[%s1565_s22 + $0x18] sm:$0xff]  ;;  %v1608_v16 = vld [vmem:[%s1565_s22 + $0x20] sm:$0xff]  ;;  %v1618_v20 = vld [vmem:[%s1565_s22 + $0x28] sm:$0xff] }
  0x12   : > { %v1601_v13 = vld [vmem:[%s1565_s22 + $0x98] sm:$0xff]  ;;  %v307_v14 = vsel %vm297_vm0, %v1598_v12, 0.0  ;;  %v1611_v17 = vld [vmem:[%s1565_s22 + $0xa0] sm:$0xff]  ;;  %v310_v18 = vsel %vm297_vm0, %v1608_v16, 0.0  ;;  %v1621_v21 = vld [vmem:[%s1565_s22 + $0xa8] sm:$0xff]  ;;  %v313_v22 = vsel %vm297_vm0, %v1618_v20, 0.0 }
  0x13   : > { %v355_v15 = vsel %vm297_vm0, %v1601_v13, 0.0  ;;  %v358_v19 = vsel %vm297_vm0, %v1611_v17, 0.0  ;;  %v361_v23 = vsel %vm297_vm0, %v1621_v21, 0.0  ;;  %v1628_v24 = vld [vmem:[%s1565_s22 + $0x30] sm:$0xff]  ;;  %v1638_v28 = vld [vmem:[%s1565_s22 + $0x38] sm:$0xff]  ;;  %v1648_v32 = vld [vmem:[%s1565_s22 + $0x40] sm:$0xff] }
  0x14   : > { %v1631_v25 = vld [vmem:[%s1565_s22 + $0xb0] sm:$0xff]  ;;  %v316_v26 = vsel %vm297_vm0, %v1628_v24, 0.0  ;;  %v1641_v29 = vld [vmem:[%s1565_s22 + $0xb8] sm:$0xff]  ;;  %v319_v30 = vsel %vm297_vm0, %v1638_v28, 0.0  ;;  %v1651_v33 = vld [vmem:[%s1565_s22 + $0xc0] sm:$0xff]  ;;  %v322_v34 = vsel %vm297_vm0, %v1648_v32, 0.0 }
  0x15   : > { %347 = vadd.xlane.f32.xlu0 %v346_v6  ;;  %350 = vadd.xlane.f32.xlu1 %v349_v7  ;;  %v364_v27 = vsel %vm297_vm0, %v1631_v25, 0.0  ;;  %v367_v31 = vsel %vm297_vm0, %v1641_v29, 0.0  ;;  %v370_v35 = vsel %vm297_vm0, %v1651_v33, 0.0  ;;  %v1658_v36 = vld [vmem:[%s1565_s22 + $0x48] sm:$0xff]  ;;  %v1668_v40 = vld [vmem:[%s1565_s22 + $0x50] sm:$0xff]  ;;  %v1678_v44 = vld [vmem:[%s1565_s22 + $0x58] sm:$0xff] }
  0x16   : > { %v1661_v37 = vld [vmem:[%s1565_s22 + $0xc8] sm:$0xff]  ;;  %v325_v38 = vsel %vm297_vm0, %v1658_v36, 0.0  ;;  %v1671_v41 = vld [vmem:[%s1565_s22 + $0xd0] sm:$0xff]  ;;  %v328_v42 = vsel %vm297_vm0, %v1668_v40, 0.0  ;;  %v1681_v45 = vld [vmem:[%s1565_s22 + $0xd8] sm:$0xff]  ;;  %v331_v46 = vsel %vm297_vm0, %v1678_v44, 0.0 }
  0x17   : > { %v373_v39 = vsel %vm297_vm0, %v1661_v37, 0.0  ;;  %v376_v43 = vsel %vm297_vm0, %v1671_v41, 0.0  ;;  %v379_v47 = vsel %vm297_vm0, %v1681_v45, 0.0  ;;  %v1688_v48 = vld [vmem:[%s1565_s22 + $0x60] sm:$0xff]  ;;  %v1698_v52 = vld [vmem:[%s1565_s22 + $0x68] sm:$0xff]  ;;  %v1708_v56 = vld [vmem:[%s1565_s22 + $0x70] sm:$0xff] }
  0x18   : > { %v1691_v49 = vld [vmem:[%s1565_s22 + $0xe0] sm:$0xff]  ;;  %v334_v50 = vsel %vm297_vm0, %v1688_v48, 0.0  ;;  %v1701_v53 = vld [vmem:[%s1565_s22 + $0xe8] sm:$0xff]  ;;  %v337_v54 = vsel %vm297_vm0, %v1698_v52, 0.0  ;;  %v1711_v57 = vld [vmem:[%s1565_s22 + $0xf0] sm:$0xff]  ;;  %v340_v58 = vsel %vm297_vm0, %v1708_v56, 0.0 }
  0x19   : > { %305 = vadd.xlane.f32.xlu0 %v304_v10  ;;  %353 = vadd.xlane.f32.xlu1 %v352_v11  ;;  %v382_v51 = vsel %vm297_vm0, %v1691_v49, 0.0  ;;  %v385_v55 = vsel %vm297_vm0, %v1701_v53, 0.0  ;;  %v388_v59 = vsel %vm297_vm0, %v1711_v57, 0.0  ;;  %v1718_v60 = vld [vmem:[%s1565_s22 + $0x78] sm:$0xff] }
  0x1a   : > { %v1721_v61 = vld [vmem:[%s1565_s22 + $0xf8] sm:$0xff]  ;;  %v343_v62 = vsel %vm297_vm0, %v1718_v60, 0.0 }
  0x1b   : > { %v391_v63 = vsel %vm297_vm0, %v1721_v61, 0.0 }
  0x1d   : > { %308 = vadd.xlane.f32.xlu0 %v307_v14  ;;  %356 = vadd.xlane.f32.xlu1 %v355_v15 }
  0x21   : > { %311 = vadd.xlane.f32.xlu0 %v310_v18  ;;  %359 = vadd.xlane.f32.xlu1 %v358_v19 }
  0x25   : > { %314 = vadd.xlane.f32.xlu0 %v313_v22  ;;  %362 = vadd.xlane.f32.xlu1 %v361_v23 }
  0x29   : > { %317 = vadd.xlane.f32.xlu0 %v316_v26  ;;  %365 = vadd.xlane.f32.xlu1 %v364_v27 }
  0x2d   : > { %320 = vadd.xlane.f32.xlu0 %v319_v30  ;;  %368 = vadd.xlane.f32.xlu1 %v367_v31 }
  0x31   : > { %323 = vadd.xlane.f32.xlu0 %v322_v34  ;;  %371 = vadd.xlane.f32.xlu1 %v370_v35 }
  0x35   : > { %326 = vadd.xlane.f32.xlu0 %v325_v38  ;;  %374 = vadd.xlane.f32.xlu1 %v373_v39 }
  0x39   : > { %329 = vadd.xlane.f32.xlu0 %v328_v42  ;;  %377 = vadd.xlane.f32.xlu1 %v376_v43 }
  0x3d   : > { %332 = vadd.xlane.f32.xlu0 %v331_v46  ;;  %380 = vadd.xlane.f32.xlu1 %v379_v47 }
  0x41   : > { %335 = vadd.xlane.f32.xlu0 %v334_v50  ;;  %383 = vadd.xlane.f32.xlu1 %v382_v51 }
  0x45   : > { %338 = vadd.xlane.f32.xlu0 %v337_v54  ;;  %386 = vadd.xlane.f32.xlu1 %v385_v55 }
  0x49   : > { %341 = vadd.xlane.f32.xlu0 %v340_v58  ;;  %389 = vadd.xlane.f32.xlu1 %v388_v59 }
  0x4d   : > { %344 = vadd.xlane.f32.xlu0 %v343_v62  ;;  %392 = vadd.xlane.f32.xlu1 %v391_v63 }
  0x9a   : > { %v300_v3 = vpop.xlane.xlu0 %299  ;;  %v303_v4 = vpop.xlane.xlu1 %302 }
  0x9b   : > { %v395_v6 = vmul.f32 0.03125, %v300_v3  ;;  %v396_v7 = vmul.f32 0.03125, %v303_v4 }
  0x9d   : > { %v1728_v10 = vsub.f32 %v1568_v0, %v395_v6  ;;  %v1731_v11 = vsub.f32 %v1571_v1, %v396_v7 }
  0x9e   : > { %v348_v14 = vpop.xlane.xlu0 %347  ;;  %v351_v15 = vpop.xlane.xlu1 %350 }
  0x9f   : > { %v411_v18 = vmul.f32 0.03125, %v348_v14  ;;  %v412_v19 = vmul.f32 0.03125, %v351_v15  ;;  %v459_v22 = vmul.f32 %v1728_v10, %v1728_v10  ;;  %v460_v23 = vmul.f32 %v1731_v11, %v1731_v11 }
  0xa1   : > { %v1738_v26 = vsub.f32 %v1574_v2, %v411_v18  ;;  %v1741_v27 = vsub.f32 %v1581_v5, %v412_v19  ;;  %v491_v0 = vsel %vm297_vm0, %v459_v22, 0.0  ;;  %v494_v31 = vsel %vm297_vm0, %v460_v23, 0.0 }
  0xa2   : > { %492 = vadd.xlane.f32.xlu0 %v491_v0  ;;  %v306_v1 = vpop.xlane.xlu0 %305  ;;  %v354_v30 = vpop.xlane.xlu1 %353 }
  0xa3   : > { %v397_v34 = vmul.f32 0.03125, %v306_v1  ;;  %v413_v35 = vmul.f32 0.03125, %v354_v30  ;;  %v475_v38 = vmul.f32 %v1738_v26, %v1738_v26  ;;  %v476_v39 = vmul.f32 %v1741_v27, %v1741_v27 }
  0xa5   : > { %v1750_v2 = vsub.f32 %v1588_v8, %v397_v34  ;;  %v1753_v5 = vsub.f32 %v1591_v9, %v413_v35  ;;  %v539_v42 = vsel %vm297_vm0, %v475_v38, 0.0  ;;  %v542_v47 = vsel %vm297_vm0, %v476_v39, 0.0 }
  0xa6   : > { %495 = vadd.xlane.f32.xlu0 %v494_v31  ;;  %540 = vadd.xlane.f32.xlu1 %v539_v42  ;;  %v309_v43 = vpop.xlane.xlu0 %308  ;;  %v357_v46 = vpop.xlane.xlu1 %356 }
  0xa7   : > { %v398_v50 = vmul.f32 0.03125, %v309_v43  ;;  %v414_v51 = vmul.f32 0.03125, %v357_v46  ;;  %v461_v54 = vmul.f32 %v1750_v2, %v1750_v2  ;;  %v477_v8 = vmul.f32 %v1753_v5, %v1753_v5 }
  0xa9   : > { %v1762_v55 = vsub.f32 %v1598_v12, %v398_v50  ;;  %v1765_v9 = vsub.f32 %v1601_v13, %v414_v51  ;;  %v497_v58 = vsel %vm297_vm0, %v461_v54, 0.0  ;;  %v545_v63 = vsel %vm297_vm0, %v477_v8, 0.0 }
  0xaa   : > { %543 = vadd.xlane.f32.xlu1 %v542_v47  ;;  %498 = vadd.xlane.f32.xlu0 %v497_v58  ;;  %v312_v59 = vpop.xlane.xlu0 %311  ;;  %v360_v62 = vpop.xlane.xlu1 %359 }
  0xab   : > { %v399_v3 = vmul.f32 0.03125, %v312_v59  ;;  %v415_v4 = vmul.f32 0.03125, %v360_v62  ;;  %v462_v6 = vmul.f32 %v1762_v55, %v1762_v55  ;;  %v478_v12 = vmul.f32 %v1765_v9, %v1765_v9 }
  0xad   : > { %v1774_v7 = vsub.f32 %v1608_v16, %v399_v3  ;;  %v1777_v13 = vsub.f32 %v1611_v17, %v415_v4  ;;  %v500_v14 = vsel %vm297_vm0, %v462_v6, 0.0  ;;  %v548_v19 = vsel %vm297_vm0, %v478_v12, 0.0 }
  0xae   : > { %546 = vadd.xlane.f32.xlu1 %v545_v63  ;;  %501 = vadd.xlane.f32.xlu0 %v500_v14  ;;  %v315_v15 = vpop.xlane.xlu0 %314  ;;  %v363_v18 = vpop.xlane.xlu1 %362 }
  0xaf   : > { %v400_v22 = vmul.f32 0.03125, %v315_v15  ;;  %v416_v23 = vmul.f32 0.03125, %v363_v18  ;;  %v463_v0 = vmul.f32 %v1774_v7, %v1774_v7  ;;  %v479_v16 = vmul.f32 %v1777_v13, %v1777_v13 }
  0xb1   : > { %v1786_v1 = vsub.f32 %v1618_v20, %v400_v22  ;;  %v1789_v17 = vsub.f32 %v1621_v21, %v416_v23  ;;  %v503_v30 = vsel %vm297_vm0, %v463_v0, 0.0  ;;  %v551_v35 = vsel %vm297_vm0, %v479_v16, 0.0 }
  0xb2   : > { %549 = vadd.xlane.f32.xlu1 %v548_v19  ;;  %504 = vadd.xlane.f32.xlu0 %v503_v30  ;;  %v318_v31 = vpop.xlane.xlu0 %317  ;;  %v366_v34 = vpop.xlane.xlu1 %365 }
  0xb3   : > { %v401_v38 = vmul.f32 0.03125, %v318_v31  ;;  %v417_v39 = vmul.f32 0.03125, %v366_v34  ;;  %v464_v42 = vmul.f32 %v1786_v1, %v1786_v1  ;;  %v480_v20 = vmul.f32 %v1789_v17, %v1789_v17 }
  0xb5   : > { %v1798_v43 = vsub.f32 %v1628_v24, %v401_v38  ;;  %v1801_v21 = vsub.f32 %v1631_v25, %v417_v39  ;;  %v506_v46 = vsel %vm297_vm0, %v464_v42, 0.0  ;;  %v554_v51 = vsel %vm297_vm0, %v480_v20, 0.0  ;;  %v795_v20 = vld [vmem:[%s2122_s3 + $0x10] sm:$0xff] }
  0xb6   : > { %552 = vadd.xlane.f32.xlu1 %v551_v35  ;;  %507 = vadd.xlane.f32.xlu0 %v506_v46  ;;  %v321_v47 = vpop.xlane.xlu0 %320  ;;  %v369_v50 = vpop.xlane.xlu1 %368 }
  0xb7   : > { %v402_v54 = vmul.f32 0.03125, %v321_v47  ;;  %v418_v8 = vmul.f32 0.03125, %v369_v50  ;;  %v465_v58 = vmul.f32 %v1798_v43, %v1798_v43  ;;  %v481_v24 = vmul.f32 %v1801_v21, %v1801_v21  ;;  %v794_v50 = vld [vmem:[%s2122_s3 + $0x8] sm:$0xff] }
  0xb9   : > { %v1810_v59 = vsub.f32 %v1638_v28, %v402_v54  ;;  %v1813_v25 = vsub.f32 %v1641_v29, %v418_v8  ;;  %v509_v62 = vsel %vm297_vm0, %v465_v58, 0.0  ;;  %v557_v4 = vsel %vm297_vm0, %v481_v24, 0.0 }
  0xba   : > { %555 = vadd.xlane.f32.xlu1 %v554_v51  ;;  %510 = vadd.xlane.f32.xlu0 %v509_v62  ;;  %v324_v63 = vpop.xlane.xlu0 %323  ;;  %v372_v3 = vpop.xlane.xlu1 %371 }
  0xbb   : > { %v403_v6 = vmul.f32 0.03125, %v324_v63  ;;  %v419_v12 = vmul.f32 0.03125, %v372_v3  ;;  %v466_v14 = vmul.f32 %v1810_v59, %v1810_v59  ;;  %v482_v28 = vmul.f32 %v1813_v25, %v1813_v25  ;;  %v793_v63 = vld [vmem:[%s2122_s3] sm:$0xff] }
  0xbd   : > { %v1822_v15 = vsub.f32 %v1648_v32, %v403_v6  ;;  %v1825_v29 = vsub.f32 %v1651_v33, %v419_v12  ;;  %v512_v18 = vsel %vm297_vm0, %v466_v14, 0.0  ;;  %v560_v23 = vsel %vm297_vm0, %v482_v28, 0.0  ;;  %v796_v33 = vld [vmem:[%s2122_s3 + $0x18] sm:$0xff] }
  0xbe   : > { %558 = vadd.xlane.f32.xlu1 %v557_v4  ;;  %513 = vadd.xlane.f32.xlu0 %v512_v18  ;;  %v327_v19 = vpop.xlane.xlu0 %326  ;;  %v375_v22 = vpop.xlane.xlu1 %374 }
  0xbf   : > { %v404_v0 = vmul.f32 0.03125, %v327_v19  ;;  %v420_v16 = vmul.f32 0.03125, %v375_v22  ;;  %v467_v30 = vmul.f32 %v1822_v15, %v1822_v15  ;;  %v483_v32 = vmul.f32 %v1825_v29, %v1825_v29  ;;  %1338 = vmatprep.subr.mxu0 %v796_v33  ;;  %1394 = vmatprep.subr.mxu1 %v796_v33 }
  0xc0   : > { %1339 = vmatpush3.msra.mxu0 %v796_v33  ;;  %1398 = vmatpush3.msra.mxu1 %v796_v33 }
  0xc1   : > { %v1837_v31 = vsub.f32 %v1658_v36, %v404_v0  ;;  %v1840_v34 = vsub.f32 %v1661_v37, %v420_v16  ;;  %v515_v35 = vsel %vm297_vm0, %v467_v30, 0.0  ;;  %v563_v42 = vsel %vm297_vm0, %v483_v32, 0.0  ;;  %1340 = vmatprep.subr.mxu0 %v795_v20  ;;  %1395 = vmatprep.subr.mxu1 %v795_v20 }
  0xc2   : > { %561 = vadd.xlane.f32.xlu1 %v560_v23  ;;  %516 = vadd.xlane.f32.xlu0 %v515_v35  ;;  %v330_v38 = vpop.xlane.xlu0 %329  ;;  %v378_v39 = vpop.xlane.xlu1 %377 }
  0xc3   : > { %v405_v46 = vmul.f32 0.03125, %v330_v38  ;;  %v421_v36 = vmul.f32 0.03125, %v378_v39  ;;  %v468_v37 = vmul.f32 %v1837_v31, %v1837_v31  ;;  %v484_v47 = vmul.f32 %v1840_v34, %v1840_v34  ;;  %1341 = vmatpush3.msra.mxu0 %v795_v20  ;;  %1399 = vmatpush3.msra.mxu1 %v795_v20 }
  0xc4   : > { %1342 = vmatprep.subr.mxu0 %v794_v50  ;;  %1396 = vmatprep.subr.mxu1 %v794_v50 }
  0xc5   : > { %v1855_v51 = vsub.f32 %v1668_v40, %v405_v46  ;;  %v1858_v54 = vsub.f32 %v1671_v41, %v421_v36  ;;  %v518_v8 = vsel %vm297_vm0, %v468_v37, 0.0  ;;  %v566_v62 = vsel %vm297_vm0, %v484_v47, 0.0  ;;  %1343 = vmatpush3.msra.mxu0 %v794_v50  ;;  %1400 = vmatpush3.msra.mxu1 %v794_v50 }
  0xc6   : > { %564 = vadd.xlane.f32.xlu1 %v563_v42  ;;  %519 = vadd.xlane.f32.xlu0 %v518_v8  ;;  %v333_v58 = vpop.xlane.xlu0 %332  ;;  %v381_v24 = vpop.xlane.xlu1 %380 }
  0xc7   : > { %v406_v3 = vmul.f32 0.03125, %v333_v58  ;;  %v422_v40 = vmul.f32 0.03125, %v381_v24  ;;  %v469_v41 = vmul.f32 %v1855_v51, %v1855_v51  ;;  %v485_v4 = vmul.f32 %v1858_v54, %v1858_v54  ;;  %1344 = vmatprep.subr.mxu0 %v793_v63  ;;  %1397 = vmatprep.subr.mxu1 %v793_v63 }
  0xc8   : > { %1345 = vmatpush3.msra.mxu0 %v793_v63  ;;  %1401 = vmatpush3.msra.mxu1 %v793_v63 }
  0xc9   : > { %v1870_v6 = vsub.f32 %v1678_v44, %v406_v3  ;;  %v1873_v12 = vsub.f32 %v1681_v45, %v422_v40  ;;  %v521_v14 = vsel %vm297_vm0, %v469_v41, 0.0  ;;  %v569_v19 = vsel %vm297_vm0, %v485_v4, 0.0 }
  0xca   : > { %567 = vadd.xlane.f32.xlu1 %v566_v62  ;;  %522 = vadd.xlane.f32.xlu0 %v521_v14  ;;  %v336_v28 = vpop.xlane.xlu0 %335  ;;  %v384_v18 = vpop.xlane.xlu1 %383 }
  0xcb   : > { %v407_v22 = vmul.f32 0.03125, %v336_v28  ;;  %v423_v23 = vmul.f32 0.03125, %v384_v18  ;;  %v470_v0 = vmul.f32 %v1870_v6, %v1870_v6  ;;  %v486_v44 = vmul.f32 %v1873_v12, %v1873_v12 }
  0xcd   : > { %v1882_v45 = vsub.f32 %v1688_v48, %v407_v22  ;;  %v1885_v16 = vsub.f32 %v1691_v49, %v423_v23  ;;  %v524_v30 = vsel %vm297_vm0, %v470_v0, 0.0  ;;  %v572_v35 = vsel %vm297_vm0, %v486_v44, 0.0 }
  0xce   : > { %570 = vadd.xlane.f32.xlu1 %v569_v19  ;;  %525 = vadd.xlane.f32.xlu0 %v524_v30  ;;  %v339_v32 = vpop.xlane.xlu0 %338  ;;  %v387_v33 = vpop.xlane.xlu1 %386 }
  0xcf   : > { %v408_v38 = vmul.f32 0.03125, %v339_v32  ;;  %v424_v39 = vmul.f32 0.03125, %v387_v33  ;;  %v471_v42 = vmul.f32 %v1882_v45, %v1882_v45  ;;  %v487_v48 = vmul.f32 %v1885_v16, %v1885_v16 }
  0xd1   : > { %v1894_v20 = vsub.f32 %v1698_v52, %v408_v38  ;;  %v1897_v49 = vsub.f32 %v1701_v53, %v424_v39  ;;  %v527_v46 = vsel %vm297_vm0, %v471_v42, 0.0  ;;  %v575_v47 = vsel %vm297_vm0, %v487_v48, 0.0 }
  0xd2   : > { %573 = vadd.xlane.f32.xlu1 %v572_v35  ;;  %528 = vadd.xlane.f32.xlu0 %v527_v46  ;;  %v342_v36 = vpop.xlane.xlu0 %341  ;;  %v390_v37 = vpop.xlane.xlu1 %389 }
  0xd3   : > { %v409_v50 = vmul.f32 0.03125, %v342_v36  ;;  %v425_v8 = vmul.f32 0.03125, %v390_v37  ;;  %v472_v58 = vmul.f32 %v1894_v20, %v1894_v20  ;;  %v488_v52 = vmul.f32 %v1897_v49, %v1897_v49 }
  0xd5   : > { %v1906_v24 = vsub.f32 %v1708_v56, %v409_v50  ;;  %v1909_v53 = vsub.f32 %v1711_v57, %v425_v8  ;;  %v530_v62 = vsel %vm297_vm0, %v472_v58, 0.0  ;;  %v578_v40 = vsel %vm297_vm0, %v488_v52, 0.0 }
  0xd6   : > { %576 = vadd.xlane.f32.xlu1 %v575_v47  ;;  %531 = vadd.xlane.f32.xlu0 %v530_v62  ;;  %v345_v63 = vpop.xlane.xlu0 %344  ;;  %v393_v3 = vpop.xlane.xlu1 %392 }
  0xd7   : > { %v410_v41 = vmul.f32 0.03125, %v345_v63  ;;  %v426_v4 = vmul.f32 0.03125, %v393_v3  ;;  %v473_v14 = vmul.f32 %v1906_v24, %v1906_v24  ;;  %v489_v56 = vmul.f32 %v1909_v53, %v1909_v53 }
  0xd9   : > { %v1918_v28 = vsub.f32 %v1718_v60, %v410_v41  ;;  %v1921_v57 = vsub.f32 %v1721_v61, %v426_v4  ;;  %v533_v18 = vsel %vm297_vm0, %v473_v14, 0.0  ;;  %v581_v19 = vsel %vm297_vm0, %v489_v56, 0.0 }
  0xda   : > { %579 = vadd.xlane.f32.xlu1 %v578_v40  ;;  %534 = vadd.xlane.f32.xlu0 %v533_v18  ;;  %v1939_v18 = vld [vmem:[%s254_s7] ss:$0 sm:$0xff] }
  0xdb   : > { %v474_v22 = vmul.f32 %v1918_v28, %v1918_v28  ;;  %v490_v23 = vmul.f32 %v1921_v57, %v1921_v57 }
  0xdd   : > { %v536_v0 = vsel %vm297_vm0, %v474_v22, 0.0  ;;  %v584_v60 = vsel %vm297_vm0, %v490_v23, 0.0 }
  0xde   : > { %582 = vadd.xlane.f32.xlu1 %v581_v19  ;;  %537 = vadd.xlane.f32.xlu0 %v536_v0 }
  0xe2   : > { %585 = vadd.xlane.f32.xlu1 %v584_v60 }
 0x12b   : > { %v493_v61 = vpop.xlane.xlu0 %492 }
 0x12c   : > { %v587_v44 = vmul.f32 0.03125, %v493_v61  ;;  %v1942_v61 = vld [vmem:[%s251_s10] ss:$0 sm:$0xff] }
 0x12e   : > { %v619_v30 = vadd.f32 1e-06, %v587_v44 }
 0x12f   : > { %v541_v32 = vpop.xlane.xlu1 %540  ;;  %v496_v33 = vpop.xlane.xlu0 %495 }
 0x130   : > { %1426 = vrsqrt.f32 %v619_v30  ;;  %v603_v35 = vmul.f32 0.03125, %v541_v32  ;;  %v588_v38 = vmul.f32 0.03125, %v496_v33 }
 0x132   : > { %v635_v39 = vadd.f32 1e-06, %v603_v35  ;;  %v620_v42 = vadd.f32 1e-06, %v588_v38 }
 0x133   : > { %v544_v48 = vpop.xlane.xlu1 %543  ;;  %v499_v46 = vpop.xlane.xlu0 %498 }
 0x134   : > { %1428 = vrsqrt.f32 %v635_v39  ;;  %v604_v36 = vmul.f32 0.03125, %v544_v48  ;;  %v589_v37 = vmul.f32 0.03125, %v499_v46 }
 0x135   : > { %1430 = vrsqrt.f32 %v620_v42 }
 0x136   : > { %v636_v47 = vadd.f32 1e-06, %v604_v36  ;;  %v621_v50 = vadd.f32 1e-06, %v589_v37 }
 0x137   : > { %v547_v8 = vpop.xlane.xlu1 %546  ;;  %v502_v58 = vpop.xlane.xlu0 %501 }
 0x138   : > { %1432 = vrsqrt.f32 %v636_v47  ;;  %v605_v52 = vmul.f32 0.03125, %v547_v8  ;;  %v590_v62 = vmul.f32 0.03125, %v502_v58 }
 0x139   : > { %1434 = vrsqrt.f32 %v621_v50 }
 0x13a   : > { %v637_v63 = vadd.f32 1e-06, %v605_v52  ;;  %v622_v3 = vadd.f32 1e-06, %v590_v62 }
 0x13b   : > { %v550_v40 = vpop.xlane.xlu1 %549  ;;  %v505_v41 = vpop.xlane.xlu0 %504 }
 0x13c   : > { %1436 = vrsqrt.f32 %v637_v63  ;;  %v606_v4 = vmul.f32 0.03125, %v550_v40  ;;  %v591_v14 = vmul.f32 0.03125, %v505_v41 }
 0x13d   : > { %v1427_v56 = vpop.eup %1426  ;;  %1438 = vrsqrt.f32 %v622_v3 }
 0x13e   : > { %v638_v19 = vadd.f32 1e-06, %v606_v4  ;;  %v623_v22 = vadd.f32 1e-06, %v591_v14  ;;  %v683_v23 = vmul.f32 %v1427_v56, %v1728_v10 }
 0x13f   : > { %v553_v0 = vpop.xlane.xlu1 %552  ;;  %v508_v60 = vpop.xlane.xlu0 %507 }
 0x140   : > { %1440 = vrsqrt.f32 %v638_v19  ;;  %v607_v44 = vmul.f32 0.03125, %v553_v0  ;;  %v592_v30 = vmul.f32 0.03125, %v508_v60  ;;  %v723_v32 = vmul.f32 %v1939_v18, %v683_v23 }
 0x141   : > { %v1429_v33 = vpop.eup %1428  ;;  %1442 = vrsqrt.f32 %v623_v22 }
 0x142   : > { %v1431_v35 = vpop.eup %1430  ;;  %v639_v38 = vadd.f32 1e-06, %v607_v44  ;;  %v624_v39 = vadd.f32 1e-06, %v592_v30  ;;  %v761_v42 = vadd.f32 %v1942_v61, %v723_v32  ;;  %v699_v48 = vmul.f32 %v1429_v33, %v1738_v26 }
 0x143   : > { %v556_v46 = vpop.xlane.xlu1 %555  ;;  %v511_v10 = vpop.xlane.xlu0 %510  ;;  %v684_v36 = vmul.f32 %v1431_v35, %v1731_v11 }
 0x144   : > { %1444 = vrsqrt.f32 %v639_v38  ;;  %v608_v37 = vmul.f32 0.03125, %v556_v46  ;;  %v593_v47 = vmul.f32 0.03125, %v511_v10  ;;  %1346 = vmatprep.mubr.msk.f32.mxu0 %vm297_vm0, %v761_v42  ;;  %v739_v50 = vmul.f32 %v1939_v18, %v699_v48 }
 0x145   : > { %v1433_v8 = vpop.eup %1432  ;;  %1446 = vrsqrt.f32 %v624_v39  ;;  %v724_v58 = vmul.f32 %v1939_v18, %v684_v36 }
 0x146   : > { %v1435_v52 = vpop.eup %1434  ;;  %v640_v62 = vadd.f32 1e-06, %v608_v37  ;;  %v625_v63 = vadd.f32 1e-06, %v593_v47  ;;  %v777_v26 = vadd.f32 %v1942_v61, %v739_v50  ;;  %v700_v3 = vmul.f32 %v1433_v8, %v1741_v27 }
 0x147   : > { %v559_v40 = vpop.xlane.xlu1 %558  ;;  %v514_v11 = vpop.xlane.xlu0 %513  ;;  %v762_v41 = vadd.f32 %v1942_v61, %v724_v58  ;;  %v685_v4 = vmul.f32 %v1435_v52, %v1750_v2 }
 0x148   : > { %1448 = vrsqrt.f32 %v640_v62  ;;  %v609_v14 = vmul.f32 0.03125, %v559_v40  ;;  %v594_v56 = vmul.f32 0.03125, %v514_v11  ;;  %1370 = vmatprep.mubr.msk.f32.mxu1 %vm297_vm0, %v777_v26  ;;  %v740_v19 = vmul.f32 %v1939_v18, %v700_v3 }
 0x149   : > { %v1437_v22 = vpop.eup %1436  ;;  %1450 = vrsqrt.f32 %v625_v63  ;;  %1347 = vmatmul.mubr.msk.f32.vlgmr.msra.gmra.mxu0 %vm297_vm0, %v762_v41  ;;  %v725_v23 = vmul.f32 %v1939_v18, %v685_v4 }
 0x14a   : > { %v1439_v27 = vpop.eup %1438  ;;  %v641_v0 = vadd.f32 1e-06, %v609_v14  ;;  %v626_v60 = vadd.f32 1e-06, %v594_v56  ;;  %v778_v44 = vadd.f32 %v1942_v61, %v740_v19  ;;  %v701_v2 = vmul.f32 %v1437_v22, %v1753_v5 }
 0x14b   : > { %v562_v30 = vpop.xlane.xlu1 %561  ;;  %v517_v32 = vpop.xlane.xlu0 %516  ;;  %v763_v33 = vadd.f32 %v1942_v61, %v725_v23  ;;  %v686_v35 = vmul.f32 %v1439_v27, %v1762_v55 }
 0x14c   : > { %1452 = vrsqrt.f32 %v641_v0  ;;  %v610_v38 = vmul.f32 0.03125, %v562_v30  ;;  %v595_v39 = vmul.f32 0.03125, %v517_v32  ;;  %1371 = vmatmul.mubr.msk.f32.vlgmr.msra.gmra.mxu1 %vm297_vm0, %v778_v44  ;;  %v741_v42 = vmul.f32 %v1939_v18, %v701_v2 }
 0x14d   : > { %v1441_v48 = vpop.eup %1440  ;;  %1454 = vrsqrt.f32 %v626_v60  ;;  %1349 = vmatprep.mubr.msk.f32.mxu0 %vm297_vm0, %v763_v33  ;;  %v726_v46 = vmul.f32 %v1939_v18, %v686_v35 }
 0x14e   : > { %v1443_v5 = vpop.eup %1442  ;;  %v642_v10 = vadd.f32 1e-06, %v610_v38  ;;  %v627_v36 = vadd.f32 1e-06, %v595_v39  ;;  %v779_v37 = vadd.f32 %v1942_v61, %v741_v42  ;;  %v702_v55 = vmul.f32 %v1441_v48, %v1765_v9 }
 0x14f   : > { %v565_v47 = vpop.xlane.xlu1 %564  ;;  %v520_v50 = vpop.xlane.xlu0 %519  ;;  %v764_v8 = vadd.f32 %v1942_v61, %v726_v46  ;;  %v687_v58 = vmul.f32 %v1443_v5, %v1774_v7 }
 0x150   : > { %1456 = vrsqrt.f32 %v642_v10  ;;  %v611_v52 = vmul.f32 0.03125, %v565_v47  ;;  %v596_v62 = vmul.f32 0.03125, %v520_v50  ;;  %1373 = vmatprep.mubr.msk.f32.mxu1 %vm297_vm0, %v779_v37  ;;  %v742_v63 = vmul.f32 %v1939_v18, %v702_v55 }
 0x151   : > { %v1445_v26 = vpop.eup %1444  ;;  %1458 = vrsqrt.f32 %v627_v36  ;;  %1350 = vmatmul.mubr.msk.f32.gmra.mxu0 %vm297_vm0, %v764_v8  ;;  %v727_v3 = vmul.f32 %v1939_v18, %v687_v58 }
 0x152   : > { %v1447_v9 = vpop.eup %1446  ;;  %v643_v40 = vadd.f32 1e-06, %v611_v52  ;;  %v628_v11 = vadd.f32 1e-06, %v596_v62  ;;  %v780_v41 = vadd.f32 %v1942_v61, %v742_v63  ;;  %v703_v7 = vmul.f32 %v1445_v26, %v1777_v13 }
 0x153   : > { %v568_v4 = vpop.xlane.xlu1 %567  ;;  %v523_v14 = vpop.xlane.xlu0 %522  ;;  %v765_v56 = vadd.f32 %v1942_v61, %v727_v3  ;;  %v688_v19 = vmul.f32 %v1447_v9, %v1786_v1 }
 0x154   : > { %1460 = vrsqrt.f32 %v643_v40  ;;  %v612_v22 = vmul.f32 0.03125, %v568_v4  ;;  %v597_v23 = vmul.f32 0.03125, %v523_v14  ;;  %1374 = vmatmul.mubr.msk.f32.gmra.mxu1 %vm297_vm0, %v780_v41  ;;  %v743_v27 = vmul.f32 %v1939_v18, %v703_v7 }
 0x155   : > { %v1449_v0 = vpop.eup %1448  ;;  %1462 = vrsqrt.f32 %v628_v11  ;;  %1352 = vmatprep.mubr.msk.f32.mxu0 %vm297_vm0, %v765_v56  ;;  %v728_v60 = vmul.f32 %v1939_v18, %v688_v19 }
 0x156   : > { %v1451_v13 = vpop.eup %1450  ;;  %v644_v44 = vadd.f32 1e-06, %v612_v22  ;;  %v629_v2 = vadd.f32 1e-06, %v597_v23  ;;  %v781_v30 = vadd.f32 %v1942_v61, %v743_v27  ;;  %v704_v1 = vmul.f32 %v1449_v0, %v1789_v17 }
 0x157   : > { %v571_v32 = vpop.xlane.xlu1 %570  ;;  %v526_v33 = vpop.xlane.xlu0 %525  ;;  %v766_v35 = vadd.f32 %v1942_v61, %v728_v60  ;;  %v689_v38 = vmul.f32 %v1451_v13, %v1798_v43 }
 0x158   : > { %1464 = vrsqrt.f32 %v644_v44  ;;  %v613_v39 = vmul.f32 0.03125, %v571_v32  ;;  %v598_v42 = vmul.f32 0.03125, %v526_v33  ;;  %1376 = vmatprep.mubr.msk.f32.mxu1 %vm297_vm0, %v781_v30  ;;  %v744_v48 = vmul.f32 %v1939_v18, %v704_v1 }
 0x159   : > { %v1453_v46 = vpop.eup %1452  ;;  %1466 = vrsqrt.f32 %v629_v2  ;;  %1353 = vmatmul.mubr.msk.f32.gmra.mxu0 %vm297_vm0, %v766_v35  ;;  %v729_v5 = vmul.f32 %v1939_v18, %v689_v38 }
 0x15a   : > { %v1455_v17 = vpop.eup %1454  ;;  %v645_v10 = vadd.f32 1e-06, %v613_v39  ;;  %v630_v36 = vadd.f32 1e-06, %v598_v42  ;;  %v782_v37 = vadd.f32 %v1942_v61, %v744_v48  ;;  %v705_v43 = vmul.f32 %v1453_v46, %v1801_v21 }
 0x15b   : > { %v574_v55 = vpop.xlane.xlu1 %573  ;;  %v529_v47 = vpop.xlane.xlu0 %528  ;;  %v767_v50 = vadd.f32 %v1942_v61, %v729_v5  ;;  %v690_v8 = vmul.f32 %v1455_v17, %v1810_v59 }
 0x15c   : > { %1468 = vrsqrt.f32 %v645_v10  ;;  %v614_v58 = vmul.f32 0.03125, %v574_v55  ;;  %v599_v52 = vmul.f32 0.03125, %v529_v47  ;;  %1377 = vmatmul.mubr.msk.f32.gmra.mxu1 %vm297_vm0, %v782_v37  ;;  %v745_v62 = vmul.f32 %v1939_v18, %v705_v43 }
 0x15d   : > { %v1457_v63 = vpop.eup %1456  ;;  %1470 = vrsqrt.f32 %v630_v36  ;;  %1355 = vmatprep.mubr.msk.f32.mxu0 %vm297_vm0, %v767_v50  ;;  %v730_v26 = vmul.f32 %v1939_v18, %v690_v8 }
 0x15e   : > { %v1459_v21 = vpop.eup %1458  ;;  %v646_v3 = vadd.f32 1e-06, %v614_v58  ;;  %v631_v9 = vadd.f32 1e-06, %v599_v52  ;;  %v783_v40 = vadd.f32 %v1942_v61, %v745_v62  ;;  %v706_v59 = vmul.f32 %v1457_v63, %v1813_v25 }
 0x15f   : > { %v577_v11 = vpop.xlane.xlu1 %576  ;;  %v532_v41 = vpop.xlane.xlu0 %531  ;;  %v768_v7 = vadd.f32 %v1942_v61, %v730_v26  ;;  %v691_v4 = vmul.f32 %v1459_v21, %v1822_v15 }
 0x160   : > { %1472 = vrsqrt.f32 %v646_v3  ;;  %v615_v14 = vmul.f32 0.03125, %v577_v11  ;;  %v600_v56 = vmul.f32 0.03125, %v532_v41  ;;  %1379 = vmatprep.mubr.msk.f32.mxu1 %vm297_vm0, %v783_v40  ;;  %v746_v19 = vmul.f32 %v1939_v18, %v706_v59 }
 0x161   : > { %v1461_v22 = vpop.eup %1460  ;;  %1474 = vrsqrt.f32 %v631_v9  ;;  %1356 = vmatmul.mubr.msk.f32.gmra.mxu0 %vm297_vm0, %v768_v7  ;;  %v731_v23 = vmul.f32 %v1939_v18, %v691_v4 }
 0x162   : > { %v1463_v25 = vpop.eup %1462  ;;  %v647_v27 = vadd.f32 1e-06, %v615_v14  ;;  %v632_v0 = vadd.f32 1e-06, %v600_v56  ;;  %v784_v60 = vadd.f32 %v1942_v61, %v746_v19  ;;  %v707_v15 = vmul.f32 %v1461_v22, %v1825_v29 }
 0x163   : > { %v580_v13 = vpop.xlane.xlu1 %579  ;;  %v535_v44 = vpop.xlane.xlu0 %534  ;;  %v769_v2 = vadd.f32 %v1942_v61, %v731_v23  ;;  %v692_v30 = vmul.f32 %v1463_v25, %v1837_v31 }
 0x164   : > { %1476 = vrsqrt.f32 %v647_v27  ;;  %v616_v1 = vmul.f32 0.03125, %v580_v13  ;;  %v601_v32 = vmul.f32 0.03125, %v535_v44  ;;  %1380 = vmatmul.mubr.msk.f32.gmra.mxu1 %vm297_vm0, %v784_v60  ;;  %v747_v33 = vmul.f32 %v1939_v18, %v707_v15 }
 0x165   : > { %v1465_v35 = vpop.eup %1464  ;;  %1478 = vrsqrt.f32 %v632_v0  ;;  %1358 = vmatprep.mubr.msk.f32.mxu0 %vm297_vm0, %v769_v2  ;;  %v732_v38 = vmul.f32 %v1939_v18, %v692_v30 }
 0x166   : > { %v1467_v29 = vpop.eup %1466  ;;  %v648_v39 = vadd.f32 1e-06, %v616_v1  ;;  %v633_v42 = vadd.f32 1e-06, %v601_v32  ;;  %v785_v48 = vadd.f32 %v1942_v61, %v747_v33  ;;  %v708_v31 = vmul.f32 %v1465_v35, %v1840_v34 }
 0x167   : > { %v583_v46 = vpop.xlane.xlu1 %582  ;;  %v538_v5 = vpop.xlane.xlu0 %537  ;;  %v770_v17 = vadd.f32 %v1942_v61, %v732_v38  ;;  %v693_v10 = vmul.f32 %v1467_v29, %v1855_v51 }
 0x168   : > { %1480 = vrsqrt.f32 %v648_v39  ;;  %v617_v36 = vmul.f32 0.03125, %v583_v46  ;;  %v602_v37 = vmul.f32 0.03125, %v538_v5  ;;  %1382 = vmatprep.mubr.msk.f32.mxu1 %vm297_vm0, %v785_v48  ;;  %v748_v43 = vmul.f32 %v1939_v18, %v708_v31 }
 0x169   : > { %v1469_v55 = vpop.eup %1468  ;;  %1482 = vrsqrt.f32 %v633_v42  ;;  %1359 = vmatmul.mubr.msk.f32.gmra.mxu0 %vm297_vm0, %v770_v17  ;;  %v733_v47 = vmul.f32 %v1939_v18, %v693_v10 }
 0x16a   : > { %v1471_v34 = vpop.eup %1470  ;;  %v649_v50 = vadd.f32 1e-06, %v617_v36  ;;  %v634_v8 = vadd.f32 1e-06, %v602_v37  ;;  %v786_v58 = vadd.f32 %v1942_v61, %v748_v43  ;;  %v709_v51 = vmul.f32 %v1469_v55, %v1858_v54 }
 0x16b   : > { %v586_v52 = vpop.xlane.xlu1 %585  ;;  %v771_v62 = vadd.f32 %v1942_v61, %v733_v47  ;;  %v694_v63 = vmul.f32 %v1471_v34, %v1870_v6 }
 0x16c   : > { %1484 = vrsqrt.f32 %v649_v50  ;;  %v618_v26 = vmul.f32 0.03125, %v586_v52  ;;  %1383 = vmatmul.mubr.msk.f32.gmra.mxu1 %vm297_vm0, %v786_v58  ;;  %v749_v21 = vmul.f32 %v1939_v18, %v709_v51 }
 0x16d   : > { %v1473_v3 = vpop.eup %1472  ;;  %1486 = vrsqrt.f32 %v634_v8  ;;  %1361 = vmatprep.mubr.msk.f32.mxu0 %vm297_vm0, %v771_v62  ;;  %v734_v9 = vmul.f32 %v1939_v18, %v694_v63 }
 0x16e   : > { %v1475_v40 = vpop.eup %1474  ;;  %v650_v59 = vadd.f32 1e-06, %v618_v26  ;;  %v787_v54 = vadd.f32 %v1942_v61, %v749_v21  ;;  %v710_v11 = vmul.f32 %v1473_v3, %v1873_v12 }
 0x16f   : > { %v772_v6 = vadd.f32 %v1942_v61, %v734_v9  ;;  %v695_v41 = vmul.f32 %v1475_v40, %v1882_v45 }
 0x170   : > { %1488 = vrsqrt.f32 %v650_v59  ;;  %1385 = vmatprep.mubr.msk.f32.mxu1 %vm297_vm0, %v787_v54  ;;  %v750_v7 = vmul.f32 %v1939_v18, %v710_v11 }
 0x171   : > { %v1477_v4 = vpop.eup %1476  ;;  %1362 = vmatmul.mubr.msk.f32.gmra.mxu0 %vm297_vm0, %v772_v6  ;;  %v735_v14 = vmul.f32 %v1939_v18, %v695_v41 }
 0x172   : > { %v1479_v56 = vpop.eup %1478  ;;  %v788_v19 = vadd.f32 %v1942_v61, %v750_v7  ;;  %v711_v22 = vmul.f32 %v1477_v4, %v1885_v16 }
 0x173   : > { %v773_v12 = vadd.f32 %v1942_v61, %v735_v14  ;;  %v696_v23 = vmul.f32 %v1479_v56, %v1894_v20 }
 0x174   : > { %1386 = vmatmul.mubr.msk.f32.gmra.mxu1 %vm297_vm0, %v788_v19  ;;  %v751_v45 = vmul.f32 %v1939_v18, %v711_v22 }
 0x175   : > { %v1481_v25 = vpop.eup %1480  ;;  %1364 = vmatprep.mubr.msk.f32.mxu0 %vm297_vm0, %v773_v12  ;;  %v736_v27 = vmul.f32 %v1939_v18, %v696_v23 }
 0x176   : > { %v1483_v0 = vpop.eup %1482  ;;  %v789_v60 = vadd.f32 %v1942_v61, %v751_v45  ;;  %v712_v15 = vmul.f32 %v1481_v25, %v1897_v49 }
 0x177   : > { %v774_v16 = vadd.f32 %v1942_v61, %v736_v27  ;;  %v697_v13 = vmul.f32 %v1483_v0, %v1906_v24 }
 0x178   : > { %1388 = vmatprep.mubr.msk.f32.mxu1 %vm297_vm0, %v789_v60  ;;  %v752_v20 = vmul.f32 %v1939_v18, %v712_v15 }
 0x179   : > { %v1485_v44 = vpop.eup %1484  ;;  %1365 = vmatmul.mubr.msk.f32.gmra.mxu0 %vm297_vm0, %v774_v16  ;;  %v737_v2 = vmul.f32 %v1939_v18, %v697_v13 }
 0x17a   : > { %v1487_v30 = vpop.eup %1486  ;;  %v790_v1 = vadd.f32 %v1942_v61, %v752_v20  ;;  %v713_v32 = vmul.f32 %v1485_v44, %v1909_v53 }
 0x17b   : > { %v775_v49 = vadd.f32 %v1942_v61, %v737_v2  ;;  %v698_v33 = vmul.f32 %v1487_v30, %v1918_v28 }
 0x17c   : > { %1389 = vmatmul.mubr.msk.f32.gmra.mxu1 %vm297_vm0, %v790_v1  ;;  %v753_v24 = vmul.f32 %v1939_v18, %v713_v32 }
 0x17d   : > { %v1489_v35 = vpop.eup %1488  ;;  %1367 = vmatprep.mubr.msk.f32.mxu0 %vm297_vm0, %v775_v49  ;;  %v738_v38 = vmul.f32 %v1939_v18, %v698_v33 }
 0x17e   : > { %v791_v29 = vadd.f32 %v1942_v61, %v753_v24  ;;  %v714_v39 = vmul.f32 %v1489_v35, %v1921_v57 }
 0x17f   : > { %v776_v53 = vadd.f32 %v1942_v61, %v738_v38 }
 0x180   : > { %1391 = vmatprep.mubr.msk.f32.mxu1 %vm297_vm0, %v791_v29  ;;  %v754_v42 = vmul.f32 %v1939_v18, %v714_v39 }
 0x181   : > { %1368 = vmatmul.mubr.msk.f32.gmra.mxu0 %vm297_vm0, %v776_v53 }
 0x182   : > { %v792_v28 = vadd.f32 %v1942_v61, %v754_v42 }
 0x184   : > { %1392 = vmatmul.mubr.msk.f32.gmra.mxu1 %vm297_vm0, %v792_v28 }
 0x209   : > { %v1348_v57 = vpop.f32.mrf.mxu0 }
 0x20a   : > { %1119 = vst [vmem:[%s2076_s13 + $0x8] sm:$0xff] %v1348_v57 }
 0x20b   : > { %v959_v18 = vpop.f32.mrf.mxu0 }
 0x20c   : > { %1118 = vst [vmem:[%s2076_s13] sm:$0xff] %v959_v18  ;;  %v1372_v61 = vpop.f32.mrf.mxu1 }
 0x20d   : > { %1135 = vst [vmem:[%s2076_s13 + $0x88] sm:$0xff] %v1372_v61 }
 0x20e   : > { %v1039_v48 = vpop.f32.mrf.mxu1 }
 0x20f   : > { %1134 = vst [vmem:[%s2076_s13 + $0x80] sm:$0xff] %v1039_v48 }
 0x211   : > { %v1351_v31 = vpop.f32.mrf.mxu0 }
 0x212   : > { %1121 = vst [vmem:[%s2076_s13 + $0x18] sm:$0xff] %v1351_v31 }
 0x213   : > { %v969_v46 = vpop.f32.mrf.mxu0 }
 0x214   : > { %1120 = vst [vmem:[%s2076_s13 + $0x10] sm:$0xff] %v969_v46  ;;  %v1375_v5 = vpop.f32.mrf.mxu1 }
 0x215   : > { %1137 = vst [vmem:[%s2076_s13 + $0x98] sm:$0xff] %v1375_v5 }
 0x216   : > { %v1049_v17 = vpop.f32.mrf.mxu1 }
 0x217   : > { %1136 = vst [vmem:[%s2076_s13 + $0x90] sm:$0xff] %v1049_v17 }
 0x219   : > { %v1354_v10 = vpop.f32.mrf.mxu0 }
 0x21a   : > { %1123 = vst [vmem:[%s2076_s13 + $0x28] sm:$0xff] %v1354_v10 }
 0x21b   : > { %v979_v36 = vpop.f32.mrf.mxu0 }
 0x21c   : > { %1122 = vst [vmem:[%s2076_s13 + $0x20] sm:$0xff] %v979_v36  ;;  %v1378_v37 = vpop.f32.mrf.mxu1 }
 0x21d   : > { %1139 = vst [vmem:[%s2076_s13 + $0xa8] sm:$0xff] %v1378_v37 }
 0x21e   : > { %v1059_v43 = vpop.f32.mrf.mxu1 }
 0x21f   : > { %1138 = vst [vmem:[%s2076_s13 + $0xa0] sm:$0xff] %v1059_v43 }
 0x221   : > { %v1357_v55 = vpop.f32.mrf.mxu0 }
 0x222   : > { %1125 = vst [vmem:[%s2076_s13 + $0x38] sm:$0xff] %v1357_v55 }
 0x223   : > { %v989_v47 = vpop.f32.mrf.mxu0 }
 0x224   : > { %1124 = vst [vmem:[%s2076_s13 + $0x30] sm:$0xff] %v989_v47  ;;  %v1381_v34 = vpop.f32.mrf.mxu1 }
 0x225   : > { %1141 = vst [vmem:[%s2076_s13 + $0xb8] sm:$0xff] %v1381_v34 }
 0x226   : > { %v1069_v50 = vpop.f32.mrf.mxu1 }
 0x227   : > { %1140 = vst [vmem:[%s2076_s13 + $0xb0] sm:$0xff] %v1069_v50 }
 0x229   : > { %v1360_v8 = vpop.f32.mrf.mxu0 }
 0x22a   : > { %1127 = vst [vmem:[%s2076_s13 + $0x48] sm:$0xff] %v1360_v8 }
 0x22b   : > { %v999_v58 = vpop.f32.mrf.mxu0 }
 0x22c   : > { %1126 = vst [vmem:[%s2076_s13 + $0x40] sm:$0xff] %v999_v58  ;;  %v1384_v51 = vpop.f32.mrf.mxu1 }
 0x22d   : > { %1143 = vst [vmem:[%s2076_s13 + $0xc8] sm:$0xff] %v1384_v51 }
 0x22e   : > { %v1079_v52 = vpop.f32.mrf.mxu1 }
 0x22f   : > { %1142 = vst [vmem:[%s2076_s13 + $0xc0] sm:$0xff] %v1079_v52 }
 0x231   : > { %v1363_v62 = vpop.f32.mrf.mxu0 }
 0x232   : > { %1129 = vst [vmem:[%s2076_s13 + $0x58] sm:$0xff] %v1363_v62 }
 0x233   : > { %v1009_v63 = vpop.f32.mrf.mxu0 }
 0x234   : > { %1128 = vst [vmem:[%s2076_s13 + $0x50] sm:$0xff] %v1009_v63  ;;  %v1387_v26 = vpop.f32.mrf.mxu1 }
 0x235   : > { %1145 = vst [vmem:[%s2076_s13 + $0xd8] sm:$0xff] %v1387_v26 }
 0x236   : > { %v1089_v21 = vpop.f32.mrf.mxu1 }
 0x237   : > { %1144 = vst [vmem:[%s2076_s13 + $0xd0] sm:$0xff] %v1089_v21 }
 0x239   : > { %v1366_v3 = vpop.f32.mrf.mxu0 }
 0x23a   : > { %1131 = vst [vmem:[%s2076_s13 + $0x68] sm:$0xff] %v1366_v3 }
 0x23b   : > { %v1019_v9 = vpop.f32.mrf.mxu0 }
 0x23c   : > { %1130 = vst [vmem:[%s2076_s13 + $0x60] sm:$0xff] %v1019_v9  ;;  %v1390_v40 = vpop.f32.mrf.mxu1 }
 0x23d   : > { %1147 = vst [vmem:[%s2076_s13 + $0xe8] sm:$0xff] %v1390_v40 }
 0x23e   : > { %v1099_v59 = vpop.f32.mrf.mxu1 }
 0x23f   : > { %1146 = vst [vmem:[%s2076_s13 + $0xe0] sm:$0xff] %v1099_v59 }
 0x241   : > { %v1369_v54 = vpop.f32.mrf.mxu0 }
 0x242   : > { %1133 = vst [vmem:[%s2076_s13 + $0x78] sm:$0xff] %v1369_v54 }
 0x243   : > { %v1029_v11 = vpop.f32.mrf.mxu0 }
 0x244   : > { %1132 = vst [vmem:[%s2076_s13 + $0x70] sm:$0xff] %v1029_v11  ;;  %v1393_v6 = vpop.f32.mrf.mxu1 }
 0x245   : > { %1149 = vst [vmem:[%s2076_s13 + $0xf8] sm:$0xff] %v1393_v6 }
 0x246   : > { %v1109_v41 = vpop.f32.mrf.mxu1 }
 0x247   : > { %1148 = vst [vmem:[%s2076_s13 + $0xf0] sm:$0xff] %v1109_v41 }
 0x248 PF: > { %s14_s17 = sadd.s32 1, %s1512_s17   ;;  %s2124_s15 = smov %s1508_s16 }
 0x249   : > { %p11_p5 = scmp.ge.s32.totalorder %s14_s17, 4   ;;  %s2125_s16 = smov %s2127_s18 }
 0x24b   :  { %13 = sbr.rel (!%p11_p5) target bundleno = 2 (0x2), region = 72 }

</bundles_post_ra>
